<compile_context>
chip_gen: v7x
topology: tpu7x:2x2x1
jax: 0.10.0
libtpu: 0.0.40
codegen_flags: <defaults>
</compile_context>

<pallas_src>
import functools
import numpy as np
import jax
import jax.numpy as jnp
from jax import lax
from jax.experimental import pallas as pl
from jax.experimental.pallas import tpu as pltpu

EPS = 1e-5


# -----------------------------------------------------------------------------
# Fused bottleneck kernel.  Per grid step, activations are (C, L) with
# L = images_per_block * H * W on the 128-lane axis (lane-dense I/O).
def bottleneck_kernel(x_ref, w1_ref, w2_ref, w3_ref, bias_ref, mask_ref,
                      alpha_ref, o_ref, *, W):
    Cmid_p = w1_ref.shape[0]
    Cout = w3_ref.shape[0]

    a1 = alpha_ref[0]
    a2 = alpha_ref[1]
    a3 = alpha_ref[2]
    ao = alpha_ref[3]
    bias = bias_ref[...]                                   # (3, Cmax, 1) f32

    x = x_ref[0]                                           # (Cin, L) bf16
    L = x.shape[1]

    # --- conv1 (1x1, BN scale folded into weights) + bias + PReLU1 ---
    h = jnp.dot(w1_ref[...], x, preferred_element_type=jnp.float32)   # (Cmid_p, L)
    h = h + bias[0, :Cmid_p]
    h = jnp.where(h > 0, h, a1 * h)

    # --- conv2 (3x3, pad=1): stack the 9 rolled+masked taps along K and run
    # a single bf16 GEMM.  pltpu.roll follows the jnp.roll convention, so the
    # tap reading input offset `off` uses shift = (-off) % L; boundary lanes
    # (and lanes that would wrap into a neighbouring image) are zeroed by the
    # host-precomputed masks.  Taps are (Cmid_p=8k, L) f32 => the sublane
    # concat is tile-aligned.
    taps = []
    for dy in range(3):
        for dx in range(3):
            if dy == 1 and dx == 1:
                taps.append(h)                             # center tap: no shift/mask
            else:
                off = (dy - 1) * W + (dx - 1)
                t = dy * 3 + dx
                taps.append(pltpu.roll(h, (-off) % L, axis=1) * mask_ref[t])
    stacked = jnp.concatenate(taps, axis=0).astype(jnp.bfloat16)       # (9*Cmid_p, L)
    h = jnp.dot(w2_ref[...], stacked, preferred_element_type=jnp.float32)  # (Cmid_p, L)
    h = h + bias[1, :Cmid_p]
    h = jnp.where(h > 0, h, a2 * h)

    # --- conv3 (1x1, BN folded) + bias + PReLU3 ---
    h = jnp.dot(w3_ref[...], h.astype(jnp.bfloat16),
                preferred_element_type=jnp.float32)                    # (Cout, L)
    h = h + bias[2, :Cout]
    h = jnp.where(h > 0, h, a3 * h)

    # --- residual add (Cout == Cin for this variant) + PReLU_out ---
    out = h + x.astype(jnp.float32)
    out = jnp.where(out > 0, out, ao * out)
    o_ref[0] = out.astype(o_ref.dtype)


# Host-side 3x3 boundary masks (valid -> 1.0, padded/wrapped -> 0.0), cached
# per (H, W, images_per_block) so they are only built once.
@functools.lru_cache(maxsize=None)
def _conv3x3_masks(H, Wd, images_per_block):
    yy, xx = np.mgrid[0:H, 0:Wd]
    m = np.empty((9, 1, H * Wd), np.float32)
    for dy in range(3):
        for dx in range(3):
            oy, ox = dy - 1, dx - 1
            valid = ((yy + oy >= 0) & (yy + oy < H) &
                     (xx + ox >= 0) & (xx + ox < Wd))
            m[dy * 3 + dx, 0] = valid.reshape(-1).astype(np.float32)
    return jnp.asarray(np.tile(m, (1, 1, images_per_block)))


def pack_bottleneck_params(p):
    """Host-side repack: fold BN (inference) into the conv weights, stack the
    3x3 taps along the contraction axis, zero-pad mid channels to a multiple
    of 8 (makes the in-kernel tap concat tile-aligned; free on the MXU), cast
    matmul operands to bf16, and consolidate biases / PReLU alphas."""
    def fold_bn(g, be, m, v):
        scale = np.asarray(g) / np.sqrt(np.asarray(v) + EPS)
        return scale, np.asarray(be) - np.asarray(m) * scale

    w1_t = np.asarray(p["w1"])                 # (Cmid, Cin, 1, 1)
    w2_t = np.asarray(p["w2"])                 # (Cmid, Cmid, 3, 3)
    w3_t = np.asarray(p["w3"])                 # (Cout, Cmid, 1, 1)
    Cmid, Cin = w1_t.shape[:2]
    Cout = w3_t.shape[0]
    Cmid_p = -(-Cmid // 8) * 8                 # pad mid channels to multiple of 8

    s1, b1 = fold_bn(p["g1"], p["be1"], p["m1"], p["v1"])
    s2, b2 = fold_bn(p["g2"], p["be2"], p["m2"], p["v2"])
    s3, b3 = fold_bn(p["g3"], p["be3"], p["m3"], p["v3"])

    w1 = np.zeros((Cmid_p, Cin), np.float32)
    w1[:Cmid] = w1_t[:, :, 0, 0] * s1[:, None]

    # (O, I, 3, 3) -> per-tap (9, O, I) -> pad -> (Cmid_p, 9*Cmid_p) with
    # contraction index k = t*Cmid_p + i (matches the in-kernel tap stacking).
    w2_tap = np.zeros((9, Cmid_p, Cmid_p), np.float32)
    w2_tap[:, :Cmid, :Cmid] = (np.transpose(w2_t, (2, 3, 0, 1)).reshape(9, Cmid, Cmid)
                               * s2[None, :, None])
    w2 = np.transpose(w2_tap, (1, 0, 2)).reshape(Cmid_p, 9 * Cmid_p)

    w3 = np.zeros((Cout, Cmid_p), np.float32)
    w3[:, :Cmid] = w3_t[:, :, 0, 0] * s3[:, None]

    Cmax = max(Cmid_p, Cout)
    bias = np.zeros((3, Cmax, 1), np.float32)
    bias[0, :Cmid, 0] = b1
    bias[1, :Cmid, 0] = b2
    bias[2, :Cout, 0] = b3

    alphas = np.array([float(p["a1"]), float(p["a2"]),
                       float(p["a3"]), float(p["ao"])], np.float32)

    return {
        "w1": jnp.asarray(w1, jnp.bfloat16),
        "w2": jnp.asarray(w2, jnp.bfloat16),
        "w3": jnp.asarray(w3, jnp.bfloat16),
        "bias": jnp.asarray(bias),
        "alphas": jnp.asarray(alphas),
    }


def bottleneck_pallas(x_nchw, packed, *, images_per_block=None):
    # TODO(synk): at production ENet resolutions (e.g. Cin=64, HW=32768) a
    # (C, L) slab plus double-buffering can exceed v7x's 32 MiB scoped-VMEM
    # default: either set pltpu.CompilerParams(vmem_limit_bytes=...) or tile
    # HW in multiples of W rows with explicit halo rows (the global-roll trick
    # does not survive HW tiling).
    N, Cin, H, Wd = x_nchw.shape
    HW = H * Wd
    if images_per_block is None:
        images_per_block = N      # v5e/v6e: one lane-dense step.  v7x: use N//2.
    assert N % images_per_block == 0
    G = N // images_per_block
    L = images_per_block * HW

    w1, w2, w3 = packed["w1"], packed["w2"], packed["w3"]
    bias, alphas = packed["bias"], packed["alphas"]
    Cmid_p = w1.shape[0]
    Cout = w3.shape[0]
    Cmax = bias.shape[1]
    assert Cout == Cin, "regular bottleneck: residual needs out_channels == in_channels"

    # Fold batch into the lane axis: (G, Cin, images_per_block*HW) in bf16.
    # Only major-axis permutes; the contiguous H*W stays on the lane axis.
    x_r = x_nchw.reshape(G, images_per_block, Cin, HW)
    x_r = jnp.transpose(x_r, (0, 2, 1, 3)).reshape(G, Cin, L).astype(jnp.bfloat16)

    masks = _conv3x3_masks(H, Wd, images_per_block)            # (9, 1, L)

    kern = functools.partial(bottleneck_kernel, W=Wd)

    grid_spec = pltpu.PrefetchScalarGridSpec(
        num_scalar_prefetch=0,
        grid=(G,),
        in_specs=[
            pl.BlockSpec((1, Cin, L), lambda g: (g, 0, 0)),          # x (bf16)
            pl.BlockSpec((Cmid_p, Cin), lambda g: (0, 0)),           # w1 (bf16, BN-folded)
            pl.BlockSpec((Cmid_p, 9 * Cmid_p), lambda g: (0, 0)),    # w2 stacked (bf16)
            pl.BlockSpec((Cout, Cmid_p), lambda g: (0, 0)),          # w3 (bf16, BN-folded)
            pl.BlockSpec((3, Cmax, 1), lambda g: (0, 0, 0)),         # biases (f32)
            pl.BlockSpec((9, 1, L), lambda g: (0, 0, 0)),            # boundary masks
            pl.BlockSpec(memory_space=pltpu.MemorySpace.SMEM),       # PReLU alphas (4,)
        ],
        out_specs=pl.BlockSpec((1, Cout, L), lambda g: (g, 0, 0)),
    )
    fn = pl.pallas_call(
        kern,
        out_shape=jax.ShapeDtypeStruct((G, Cout, L), jnp.float32),
        grid_spec=grid_spec,
        compiler_params=pltpu.CompilerParams(
            dimension_semantics=("parallel",)),   # v7x: shard blocks over 2 TCs
    )
    out = fn(x_r, w1, w2, w3, bias, masks, alphas)

    out = out.reshape(G, Cout, images_per_block, HW)
    out = jnp.transpose(out, (0, 2, 1, 3)).reshape(N, Cout, H, Wd)
    return out


# ------------------------- pure-JAX reference (NCHW) -------------------------
def _bn(x, gamma, beta, mean, var):
    shp = (1, -1, 1, 1)
    return ((x - mean.reshape(shp)) / jnp.sqrt(var.reshape(shp) + EPS)
            * gamma.reshape(shp) + beta.reshape(shp))


def _prelu(x, a):
    return jnp.where(x > 0, x, a * x)


def _conv(x, w, pad):
    return lax.conv_general_dilated(
        x, w, window_strides=(1, 1), padding=((pad, pad), (pad, pad)),
        dimension_numbers=("NCHW", "OIHW", "NCHW"))


def bottleneck_ref(x, p):
    h = _prelu(_bn(_conv(x, p["w1"], 0), p["g1"], p["be1"], p["m1"], p["v1"]), p["a1"])
    h = _prelu(_bn(_conv(h, p["w2"], 1), p["g2"], p["be2"], p["m2"], p["v2"]), p["a2"])
    h = _prelu(_bn(_conv(h, p["w3"], 0), p["g3"], p["be3"], p["m3"], p["v3"]), p["a3"])
    return _prelu(h + x, p["ao"])


if __name__ == "__main__":
    N, Cin, H, W = 2, 16, 16, 16
    Cmid, Cout = Cin // 4, Cin        # proj_ratio=4, out_channels=None -> same as in

    key = jax.random.PRNGKey(0)
    ks = jax.random.split(key, 20)
    f32 = jnp.float32

    p = {
        "w1": 0.2 * jax.random.normal(ks[0], (Cmid, Cin, 1, 1), f32),
        "w2": 0.2 * jax.random.normal(ks[1], (Cmid, Cmid, 3, 3), f32),
        "w3": 0.2 * jax.random.normal(ks[2], (Cout, Cmid, 1, 1), f32),
        "g1": 1.0 + 0.1 * jax.random.normal(ks[3], (Cmid,), f32),
        "be1": 0.1 * jax.random.normal(ks[4], (Cmid,), f32),
        "m1": 0.1 * jax.random.normal(ks[5], (Cmid,), f32),
        "v1": 0.5 + jnp.abs(jax.random.normal(ks[6], (Cmid,), f32)),
        "g2": 1.0 + 0.1 * jax.random.normal(ks[7], (Cmid,), f32),
        "be2": 0.1 * jax.random.normal(ks[8], (Cmid,), f32),
        "m2": 0.1 * jax.random.normal(ks[9], (Cmid,), f32),
        "v2": 0.5 + jnp.abs(jax.random.normal(ks[10], (Cmid,), f32)),
        "g3": 1.0 + 0.1 * jax.random.normal(ks[11], (Cout,), f32),
        "be3": 0.1 * jax.random.normal(ks[12], (Cout,), f32),
        "m3": 0.1 * jax.random.normal(ks[13], (Cout,), f32),
        "v3": 0.5 + jnp.abs(jax.random.normal(ks[14], (Cout,), f32)),
        "a1": jnp.asarray(0.25, f32),   # nn.PReLU() default: single scalar weight
        "a2": jnp.asarray(0.20, f32),
        "a3": jnp.asarray(0.15, f32),
        "ao": jnp.asarray(0.10, f32),
    }

    x_nchw = jax.random.normal(ks[15], (N, Cin, H, W), f32)

    packed = pack_bottleneck_params(p)
    out = bottleneck_pallas(x_nchw, packed)
    jax.block_until_ready(out)

    ref = bottleneck_ref(x_nchw, p)
    # bf16 matmul operands (f32 accumulate) -> loosened tolerance vs the pure
    # f32 reference; a logic error (roll sign, tap stacking) would be O(1) off.
    np.testing.assert_allclose(np.asarray(out), np.asarray(ref), rtol=5e-2, atol=5e-2)
    print("KERNEL_OK")
</pallas_src>

<mosaic_0001>
module attributes {stable_mosaic.version = 11 : i64} {
  func.func @bottleneck_kernel(%arg0: i32, %arg1: memref<1x16x512xbf16, #tpu.memory_space<vmem>>, %arg2: memref<8x16xbf16, #tpu.memory_space<vmem>>, %arg3: memref<8x72xbf16, #tpu.memory_space<vmem>>, %arg4: memref<16x8xbf16, #tpu.memory_space<vmem>>, %arg5: memref<3x16x1xf32, #tpu.memory_space<vmem>>, %arg6: memref<9x1x512xf32, #tpu.memory_space<vmem>>, %arg7: memref<4xf32, #tpu.memory_space<smem>>, %arg8: memref<1x16x512xf32, #tpu.memory_space<vmem>>) attributes {dimension_semantics = [#tpu.dimension_semantics<parallel>], iteration_bounds = array<i64: 1>, scalar_prefetch = 0 : i64, scratch_operands = 0 : i64, tpu.core_type = #tpu.core_type<tc>, window_params = [{transform_indices = @transform_0, window_bounds = array<i64: 1, 16, 512>}, {pipeline_mode = #tpu.pipeline_mode<synchronous>, transform_indices = @transform_1, window_bounds = array<i64: 8, 16>}, {pipeline_mode = #tpu.pipeline_mode<synchronous>, transform_indices = @transform_2, window_bounds = array<i64: 8, 72>}, {pipeline_mode = #tpu.pipeline_mode<synchronous>, transform_indices = @transform_3, window_bounds = array<i64: 16, 8>}, {pipeline_mode = #tpu.pipeline_mode<synchronous>, transform_indices = @transform_4, window_bounds = array<i64: 3, 16, 1>}, {pipeline_mode = #tpu.pipeline_mode<synchronous>, transform_indices = @transform_5, window_bounds = array<i64: 9, 1, 512>}, {transform_indices = @transform_6, window_bounds = array<i64: 4>}, {transform_indices = @transform_7, window_bounds = array<i64: 1, 16, 512>}]} {
    %c0 = arith.constant 0 : index
    %0 = memref.load %arg7[%c0] : memref<4xf32, #tpu.memory_space<smem>>
    %c1 = arith.constant 1 : index
    %1 = memref.load %arg7[%c1] : memref<4xf32, #tpu.memory_space<smem>>
    %c2 = arith.constant 2 : index
    %2 = memref.load %arg7[%c2] : memref<4xf32, #tpu.memory_space<smem>>
    %c3 = arith.constant 3 : index
    %3 = memref.load %arg7[%c3] : memref<4xf32, #tpu.memory_space<smem>>
    %c0_0 = arith.constant 0 : index
    %c0_1 = arith.constant 0 : index
    %c0_2 = arith.constant 0 : index
    %4 = vector.load %arg5[%c0_0, %c0_1, %c0_2] : memref<3x16x1xf32, #tpu.memory_space<vmem>>, vector<3x16x1xf32>
    %c0_3 = arith.constant 0 : index
    %c0_4 = arith.constant 0 : index
    %c0_5 = arith.constant 0 : index
    %5 = vector.load %arg1[%c0_3, %c0_4, %c0_5] : memref<1x16x512xbf16, #tpu.memory_space<vmem>>, vector<1x16x512xbf16>
    %6 = vector.shape_cast %5 : vector<1x16x512xbf16> to vector<16x512xbf16>
    %c0_6 = arith.constant 0 : index
    %c0_7 = arith.constant 0 : index
    %7 = vector.load %arg2[%c0_6, %c0_7] : memref<8x16xbf16, #tpu.memory_space<vmem>>, vector<8x16xbf16>
    %cst = arith.constant dense<0.000000e+00> : vector<8x512xf32>
    %8 = tpu.matmul %7, %6, %cst {dimension_numbers = #tpu.dot_dimension_numbers<[1], [0], [0], [1], [0, 0, 1, 1], [], []>} : vector<8x16xbf16>, vector<16x512xbf16>, vector<8x512xf32> -> vector<8x512xf32>
    %9 = vector.extract_strided_slice %4 {offsets = [0, 0, 0], sizes = [1, 8, 1], strides = [1, 1, 1]} : vector<3x16x1xf32> to vector<1x8x1xf32>
    %10 = vector.shape_cast %9 : vector<1x8x1xf32> to vector<8x1xf32>
    %11 = vector.broadcast %10 : vector<8x1xf32> to vector<8x512xf32>
    %12 = arith.addf %8, %11 : vector<8x512xf32>
    %cst_8 = arith.constant 0.000000e+00 : f32
    %13 = vector.broadcast %cst_8 : f32 to vector<8x512xf32>
    %14 = arith.cmpf ogt, %12, %13 : vector<8x512xf32>
    %15 = vector.broadcast %0 : f32 to vector<8x512xf32>
    %16 = arith.mulf %15, %12 : vector<8x512xf32>
    %17 = arith.select %14, %12, %16 : vector<8x512xi1>, vector<8x512xf32>
    %c17_i32 = arith.constant 17 : i32
    %18 = tpu.dynamic_rotate %17 by %c17_i32 dim 1 : vector<8x512xf32>, i32 -> vector<8x512xf32>
    %c0_9 = arith.constant 0 : index
    %c0_10 = arith.constant 0 : index
    %c0_11 = arith.constant 0 : index
    %19 = vector.load %arg6[%c0_9, %c0_10, %c0_11] : memref<9x1x512xf32, #tpu.memory_space<vmem>>, vector<1x1x512xf32>
    %20 = vector.shape_cast %19 : vector<1x1x512xf32> to vector<1x512xf32>
    %21 = vector.broadcast %20 : vector<1x512xf32> to vector<8x512xf32>
    %22 = arith.mulf %18, %21 : vector<8x512xf32>
    %c16_i32 = arith.constant 16 : i32
    %23 = tpu.dynamic_rotate %17 by %c16_i32 dim 1 : vector<8x512xf32>, i32 -> vector<8x512xf32>
    %c1_12 = arith.constant 1 : index
    %c0_13 = arith.constant 0 : index
    %c0_14 = arith.constant 0 : index
    %24 = vector.load %arg6[%c1_12, %c0_13, %c0_14] : memref<9x1x512xf32, #tpu.memory_space<vmem>>, vector<1x1x512xf32>
    %25 = vector.shape_cast %24 : vector<1x1x512xf32> to vector<1x512xf32>
    %26 = vector.broadcast %25 : vector<1x512xf32> to vector<8x512xf32>
    %27 = arith.mulf %23, %26 : vector<8x512xf32>
    %c15_i32 = arith.constant 15 : i32
    %28 = tpu.dynamic_rotate %17 by %c15_i32 dim 1 : vector<8x512xf32>, i32 -> vector<8x512xf32>
    %c2_15 = arith.constant 2 : index
    %c0_16 = arith.constant 0 : index
    %c0_17 = arith.constant 0 : index
    %29 = vector.load %arg6[%c2_15, %c0_16, %c0_17] : memref<9x1x512xf32, #tpu.memory_space<vmem>>, vector<1x1x512xf32>
    %30 = vector.shape_cast %29 : vector<1x1x512xf32> to vector<1x512xf32>
    %31 = vector.broadcast %30 : vector<1x512xf32> to vector<8x512xf32>
    %32 = arith.mulf %28, %31 : vector<8x512xf32>
    %c1_i32 = arith.constant 1 : i32
    %33 = tpu.dynamic_rotate %17 by %c1_i32 dim 1 : vector<8x512xf32>, i32 -> vector<8x512xf32>
    %c3_18 = arith.constant 3 : index
    %c0_19 = arith.constant 0 : index
    %c0_20 = arith.constant 0 : index
    %34 = vector.load %arg6[%c3_18, %c0_19, %c0_20] : memref<9x1x512xf32, #tpu.memory_space<vmem>>, vector<1x1x512xf32>
    %35 = vector.shape_cast %34 : vector<1x1x512xf32> to vector<1x512xf32>
    %36 = vector.broadcast %35 : vector<1x512xf32> to vector<8x512xf32>
    %37 = arith.mulf %33, %36 : vector<8x512xf32>
    %c511_i32 = arith.constant 511 : i32
    %38 = tpu.dynamic_rotate %17 by %c511_i32 dim 1 : vector<8x512xf32>, i32 -> vector<8x512xf32>
    %c5 = arith.constant 5 : index
    %c0_21 = arith.constant 0 : index
    %c0_22 = arith.constant 0 : index
    %39 = vector.load %arg6[%c5, %c0_21, %c0_22] : memref<9x1x512xf32, #tpu.memory_space<vmem>>, vector<1x1x512xf32>
    %40 = vector.shape_cast %39 : vector<1x1x512xf32> to vector<1x512xf32>
    %41 = vector.broadcast %40 : vector<1x512xf32> to vector<8x512xf32>
    %42 = arith.mulf %38, %41 : vector<8x512xf32>
    %c497_i32 = arith.constant 497 : i32
    %43 = tpu.dynamic_rotate %17 by %c497_i32 dim 1 : vector<8x512xf32>, i32 -> vector<8x512xf32>
    %c6 = arith.constant 6 : index
    %c0_23 = arith.constant 0 : index
    %c0_24 = arith.constant 0 : index
    %44 = vector.load %arg6[%c6, %c0_23, %c0_24] : memref<9x1x512xf32, #tpu.memory_space<vmem>>, vector<1x1x512xf32>
    %45 = vector.shape_cast %44 : vector<1x1x512xf32> to vector<1x512xf32>
    %46 = vector.broadcast %45 : vector<1x512xf32> to vector<8x512xf32>
    %47 = arith.mulf %43, %46 : vector<8x512xf32>
    %c496_i32 = arith.constant 496 : i32
    %48 = tpu.dynamic_rotate %17 by %c496_i32 dim 1 : vector<8x512xf32>, i32 -> vector<8x512xf32>
    %c7 = arith.constant 7 : index
    %c0_25 = arith.constant 0 : index
    %c0_26 = arith.constant 0 : index
    %49 = vector.load %arg6[%c7, %c0_25, %c0_26] : memref<9x1x512xf32, #tpu.memory_space<vmem>>, vector<1x1x512xf32>
    %50 = vector.shape_cast %49 : vector<1x1x512xf32> to vector<1x512xf32>
    %51 = vector.broadcast %50 : vector<1x512xf32> to vector<8x512xf32>
    %52 = arith.mulf %48, %51 : vector<8x512xf32>
    %c495_i32 = arith.constant 495 : i32
    %53 = tpu.dynamic_rotate %17 by %c495_i32 dim 1 : vector<8x512xf32>, i32 -> vector<8x512xf32>
    %c8 = arith.constant 8 : index
    %c0_27 = arith.constant 0 : index
    %c0_28 = arith.constant 0 : index
    %54 = vector.load %arg6[%c8, %c0_27, %c0_28] : memref<9x1x512xf32, #tpu.memory_space<vmem>>, vector<1x1x512xf32>
    %55 = vector.shape_cast %54 : vector<1x1x512xf32> to vector<1x512xf32>
    %56 = vector.broadcast %55 : vector<1x512xf32> to vector<8x512xf32>
    %57 = arith.mulf %53, %56 : vector<8x512xf32>
    %58 = tpu.concatenate %22, %27, %32, %37, %17, %42, %47, %52, %57 in 0 : vector<8x512xf32>, vector<8x512xf32>, vector<8x512xf32>, vector<8x512xf32>, vector<8x512xf32>, vector<8x512xf32>, vector<8x512xf32>, vector<8x512xf32>, vector<8x512xf32> -> vector<72x512xf32>
    %59 = arith.truncf %58 : vector<72x512xf32> to vector<72x512xbf16>
    %c0_29 = arith.constant 0 : index
    %c0_30 = arith.constant 0 : index
    %60 = vector.load %arg3[%c0_29, %c0_30] : memref<8x72xbf16, #tpu.memory_space<vmem>>, vector<8x72xbf16>
    %cst_31 = arith.constant dense<0.000000e+00> : vector<8x512xf32>
    %61 = tpu.matmul %60, %59, %cst_31 {dimension_numbers = #tpu.dot_dimension_numbers<[1], [0], [0], [1], [0, 0, 1, 1], [], []>} : vector<8x72xbf16>, vector<72x512xbf16>, vector<8x512xf32> -> vector<8x512xf32>
    %62 = vector.extract_strided_slice %4 {offsets = [1, 0, 0], sizes = [1, 8, 1], strides = [1, 1, 1]} : vector<3x16x1xf32> to vector<1x8x1xf32>
    %63 = vector.shape_cast %62 : vector<1x8x1xf32> to vector<8x1xf32>
    %64 = vector.broadcast %63 : vector<8x1xf32> to vector<8x512xf32>
    %65 = arith.addf %61, %64 : vector<8x512xf32>
    %cst_32 = arith.constant 0.000000e+00 : f32
    %66 = vector.broadcast %cst_32 : f32 to vector<8x512xf32>
    %67 = arith.cmpf ogt, %65, %66 : vector<8x512xf32>
    %68 = vector.broadcast %1 : f32 to vector<8x512xf32>
    %69 = arith.mulf %68, %65 : vector<8x512xf32>
    %70 = arith.select %67, %65, %69 : vector<8x512xi1>, vector<8x512xf32>
    %c0_33 = arith.constant 0 : index
    %c0_34 = arith.constant 0 : index
    %71 = vector.load %arg4[%c0_33, %c0_34] : memref<16x8xbf16, #tpu.memory_space<vmem>>, vector<16x8xbf16>
    %72 = arith.truncf %70 : vector<8x512xf32> to vector<8x512xbf16>
    %cst_35 = arith.constant dense<0.000000e+00> : vector<16x512xf32>
    %73 = tpu.matmul %71, %72, %cst_35 {dimension_numbers = #tpu.dot_dimension_numbers<[1], [0], [0], [1], [0, 0, 1, 1], [], []>} : vector<16x8xbf16>, vector<8x512xbf16>, vector<16x512xf32> -> vector<16x512xf32>
    %74 = vector.extract_strided_slice %4 {offsets = [2, 0, 0], sizes = [1, 16, 1], strides = [1, 1, 1]} : vector<3x16x1xf32> to vector<1x16x1xf32>
    %75 = vector.shape_cast %74 : vector<1x16x1xf32> to vector<16x1xf32>
    %76 = vector.broadcast %75 : vector<16x1xf32> to vector<16x512xf32>
    %77 = arith.addf %73, %76 : vector<16x512xf32>
    %cst_36 = arith.constant 0.000000e+00 : f32
    %78 = vector.broadcast %cst_36 : f32 to vector<16x512xf32>
    %79 = arith.cmpf ogt, %77, %78 : vector<16x512xf32>
    %80 = vector.broadcast %2 : f32 to vector<16x512xf32>
    %81 = arith.mulf %80, %77 : vector<16x512xf32>
    %82 = arith.select %79, %77, %81 : vector<16x512xi1>, vector<16x512xf32>
    %83 = arith.extf %6 : vector<16x512xbf16> to vector<16x512xf32>
    %84 = arith.addf %82, %83 : vector<16x512xf32>
    %cst_37 = arith.constant 0.000000e+00 : f32
    %85 = vector.broadcast %cst_37 : f32 to vector<16x512xf32>
    %86 = arith.cmpf ogt, %84, %85 : vector<16x512xf32>
    %87 = vector.broadcast %3 : f32 to vector<16x512xf32>
    %88 = arith.mulf %87, %84 : vector<16x512xf32>
    %89 = arith.select %86, %84, %88 : vector<16x512xi1>, vector<16x512xf32>
    %c0_38 = arith.constant 0 : index
    %c0_39 = arith.constant 0 : index
    %c0_40 = arith.constant 0 : index
    %90 = vector.load %arg8[%c0_38, %c0_39, %c0_40] : memref<1x16x512xf32, #tpu.memory_space<vmem>>, vector<1x16x512xf32>
    %91 = vector.shape_cast %90 : vector<1x16x512xf32> to vector<16x512xf32>
    %92 = vector.shape_cast %89 : vector<16x512xf32> to vector<1x16x512xf32>
    tpu.vector_store %arg8[%c0_38, %c0_39, %c0_40], %92 {strides = array<i32>} : memref<1x16x512xf32, #tpu.memory_space<vmem>>, vector<1x16x512xf32>,
    return
  }
  func.func @transform_0(%arg0: i32) -> (i32, i32, i32) {
    %c0_i32 = arith.constant 0 : i32
    %c0_i32_0 = arith.constant 0 : i32
    %c0_i32_1 = arith.constant 0 : i32
    return %arg0, %c0_i32, %c0_i32_0 : i32, i32, i32
  }
  func.func @transform_1(%arg0: i32) -> (i32, i32) {
    %c0_i32 = arith.constant 0 : i32
    %c0_i32_0 = arith.constant 0 : i32
    %c0_i32_1 = arith.constant 0 : i32
    return %c0_i32, %c0_i32_0 : i32, i32
  }
  func.func @transform_2(%arg0: i32) -> (i32, i32) {
    %c0_i32 = arith.constant 0 : i32
    %c0_i32_0 = arith.constant 0 : i32
    %c0_i32_1 = arith.constant 0 : i32
    return %c0_i32, %c0_i32_0 : i32, i32
  }
  func.func @transform_3(%arg0: i32) -> (i32, i32) {
    %c0_i32 = arith.constant 0 : i32
    %c0_i32_0 = arith.constant 0 : i32
    %c0_i32_1 = arith.constant 0 : i32
    return %c0_i32, %c0_i32_0 : i32, i32
  }
  func.func @transform_4(%arg0: i32) -> (i32, i32, i32) {
    %c0_i32 = arith.constant 0 : i32
    %c0_i32_0 = arith.constant 0 : i32
    %c0_i32_1 = arith.constant 0 : i32
    %c0_i32_2 = arith.constant 0 : i32
    return %c0_i32, %c0_i32_0, %c0_i32_1 : i32, i32, i32
  }
  func.func @transform_5(%arg0: i32) -> (i32, i32, i32) {
    %c0_i32 = arith.constant 0 : i32
    %c0_i32_0 = arith.constant 0 : i32
    %c0_i32_1 = arith.constant 0 : i32
    %c0_i32_2 = arith.constant 0 : i32
    return %c0_i32, %c0_i32_0, %c0_i32_1 : i32, i32, i32
  }
  func.func @transform_6(%arg0: i32) -> i32 {
    %c0_i32 = arith.constant 0 : i32
    %c0_i32_0 = arith.constant 0 : i32
    return %c0_i32 : i32
  }
  func.func @transform_7(%arg0: i32) -> (i32, i32, i32) {
    %c0_i32 = arith.constant 0 : i32
    %c0_i32_0 = arith.constant 0 : i32
    %c0_i32_1 = arith.constant 0 : i32
    return %arg0, %c0_i32, %c0_i32_0 : i32, i32, i32
  }
}

</mosaic_0001>

<bundles_post_ra>
// kernel: tpu_custom_call.1
= control target key start
LH: loop header
LB: loop body
LE: loop exit
PB: predicated region body
PF: predicated region fallthrough
CT: control target
= control target key end

     0   :  { %12 = vsyncpa [#allocation3], 0  ;;  %s1517_s0 = inlined_call_operand.vmem [shape: bf16[1,16,512], index: 0, kind: input, shape index: {}]   ;;  %s1518_s1 = inlined_call_operand.hbm [shape: bf16[8,16], index: 1, kind: input, shape index: {}]   ;;  %s1519_s2 = inlined_call_operand.hbm [shape: bf16[8,72], index: 2, kind: input, shape index: {}]   ;;  %s1520_s3 = inlined_call_operand.vmem [shape: bf16[16,8], index: 3, kind: input, shape index: {}]   ;;  %s1521_s4 = inlined_call_operand.vmem [shape: f32[3,16,1], index: 4, kind: input, shape index: {}]   ;;  %s1522_s5 = inlined_call_operand.vmem [shape: f32[9,1,512], index: 5, kind: input, shape index: {}]   ;;  %s1523_s6 = inlined_call_operand.vmem [shape: f32[4], index: 6, kind: input, shape index: {}]   ;;  %s1524_s7 = inlined_call_operand.hbm [shape: f32[1,16,512], index: 7, kind: output, shape index: {}]  }
   0x1   :  { %13 = vsyncpa [#allocation7], 0 }
   0x2   :  { %14 = vsyncpa [#allocation5], 0 }
   0x3   :  { %15 = vsyncpa [#allocation4], 0  ;;  %s1010_s24 = smov [#allocation2]   ;;  %s1011_s26 = smov [#allocation6]  }
   0x4   :  { %s24_s25 = sshll.u32 %s1010_s24, 4  ;;  %s34_s27 = sshll.u32 %s1011_s26, 4  ;;  %s25_s25 = int_to_ptr.vmem [resolvable:$true] %s24_s25  ;;  %s35_s27 = int_to_ptr.vmem [resolvable:$true] %s34_s27 }
   0x5   :  { %s924_s30 = scalar_lea.hbm %s1518_s1, 64 }
   0x6   :  { %p925_p0 = scmp.ne.s32.totalorder %s1518_s1, %s924_s30  ;;  %p928_p1 = scmp.lt.u32.totalorder %s924_s30, %s1518_s1 }
   0x8   :  { %p930_p2 = pnand %p928_p1, %p925_p0 }
   0xa   :  { %933 = shalt.err (!%p930_p2)
}
   0xb   :  { %s934_s12 = scalar_lea.vmem %s25_s25, 64  ;;  %p939_p4 = scmp.lt.s32.totalorder %s25_s25, %s25_s25 }
   0xc   :  { %p935_p3 = scmp.ne.s32.totalorder %s25_s25, %s934_s12  ;;  %p940_p5 = scmp.lt.s32.totalorder %s934_s12, %s934_s12 }
   0xe   :  { %p941_p6 = por %p940_p5, %p939_p4 }
  0x10   :  { %p942_p7 = pnand %p941_p6, %p935_p3 }
  0x12   :  { %945 = shalt.err (!%p942_p7)
}
  0x13   :  { %27 = dma.hbm_to_vmem [thread:$0]  %s1518_s1, 64, %s25_s25, [#allocation3]  }
  0x14   :  { %s946_s17 = scalar_lea.hbm %s1519_s2, 64 }
  0x15   :  { %p947_p8 = scmp.ne.s32.totalorder %s1519_s2, %s946_s17  ;;  %p950_p9 = scmp.lt.u32.totalorder %s946_s17, %s1519_s2 }
  0x17   :  { %p952_p10 = pnand %p950_p9, %p947_p8 }
  0x19   :  { %955 = shalt.err (!%p952_p10)
}
  0x1a   :  { %s956_s22 = scalar_lea.vmem %s35_s27, 64  ;;  %p961_p12 = scmp.lt.s32.totalorder %s35_s27, %s35_s27 }
  0x1b   :  { %p957_p11 = scmp.ne.s32.totalorder %s35_s27, %s956_s22  ;;  %p962_p13 = scmp.lt.s32.totalorder %s956_s22, %s956_s22 }
  0x1d   :  { %p963_p0 = por %p962_p13, %p961_p12 }
  0x1f   :  { %p964_p1 = pnand %p963_p0, %p957_p11 }
  0x21   :  { %967 = shalt.err (!%p964_p1)
}
  0x22   :  { %37 = dma.hbm_to_vmem [thread:$0]  %s1519_s2, 64, %s35_s27, [#allocation7]  }
  0x23   :  { %s50_s26 = sshll.u32 %s1523_s6, 4  ;;  %s51_s26 = int_to_ptr.vmem [resolvable:$true] %s50_s26 }
  0x24   :  { %s968_s28 = scalar_lea.vmem %s51_s26, 16  ;;  %p973_p3 = scmp.lt.s32.totalorder %s51_s26, %s51_s26 }
  0x25   :  { %p969_p2 = scmp.ne.s32.totalorder %s51_s26, %s968_s28  ;;  %p974_p4 = scmp.lt.s32.totalorder %s968_s28, %s968_s28 }
  0x27   :  { %p975_p5 = por %p974_p4, %p973_p3 }
  0x29   :  { %p976_p6 = pnand %p975_p5, %p969_p2 }
  0x2b   :  { %979 = shalt.err (!%p976_p6)
}
  0x2c   :  { %s1012_s29 = smov [#allocation8]  }
  0x2d   :  { %53 = dma.vmem_to_smem %s51_s26, 16, %s1012_s29, [#allocation5]  }
  0x2e   :  { %1002 = dma.done.wait [#allocation3], 64  }
  0x2f   :  { %1003 = vsyncadd [#allocation3], 4294967232 }
  0x30   :  { %1004 = dma.done.wait [#allocation7], 64  }
  0x31   :  { %1005 = vsyncadd [#allocation7], 4294967232 }
  0x32   :  { %1006 = dma.done.wait [#allocation5], 16  }
  0x33   :  { %1007 = vsyncadd [#allocation5], 4294967280 }
  0x34   :  { %63 = sfence }
  0x35   :  { %v1095_v0 = vld [vmem:[%s1517_s0] sm:$0xff]  ;;  %v1100_v1 = vld [vmem:[%s1517_s0 + $0x10] sm:$0xff]  ;;  %v1105_v2 = vld [vmem:[%s1517_s0 + $0x8] sm:$0xff]  ;;  %v1525_v6 = vmov 0   ;;  %vm103_vm0 = vcmask 130048   ;;  %s1014_s14 = smov 17   ;;  %v210_v36 = vlaneseq }
  0x36   :  { %v881_v3 = vcombine.high %v1095_v0, %v1100_v1  ;;  %v1112_v4 = vld [vmem:[%s1517_s0 + $0x18] sm:$0xff]  ;;  %v880_v5 = vcombine.low %v1095_v0, %v1100_v1  ;;  %139 = vmatprep.mubr.bf16.mxu0 %v1525_v6  ;;  %180 = vmatprep.mubr.bf16.mxu1 %v1525_v6  ;;  %v69_v7 = vld [vmem:[%s1521_s4] sm:$0xff]  ;;  %s65_s0 = sld [smem:[#allocation8]]  ;;  %s1015_s15 = smov 16   ;;  %v70_v34 = vld [vmem:[%s1521_s4 + $0x10] sm:$0xff]  ;;  %vm553_vm13 = vcmask 1043456  }
  0x37   :  { %v883_v8 = vcombine.high %v1105_v2, %v1112_v4  ;;  %v882_v9 = vcombine.low %v1105_v2, %v1112_v4  ;;  %917 = vset.pattern.permute.xlu0 %v1525_v6  ;;  %918 = vset.pattern.permute.xlu1 %v1525_v6  ;;  %v77_v10 = vld [vmem:[#allocation2] sm:$0xf]  ;;  %s1016_s16 = smov 15   ;;  %s1017_s17 = smov 1   ;;  %v72_v35 = vld [vmem:[%s1521_s4 + $0x28] sm:$0xff]  ;;  %v220_v39 = vshrl.u32 %v210_v36, 7 }
  0x38   :  { %107 = vmatprep.subr.bf16.mxu0 %v881_v3  ;;  %80 = vperm.xlu0 %917, %v69_v7   ;;  %s1018_s18 = smov 127   ;;  %s1019_s19 = smov 113   ;;  %v71_v33 = vld [vmem:[%s1521_s4 + $0x20] sm:$0xff]  ;;  %v1186_v40 = vand.u32 127, %v210_v36  ;;  %vm549_vm14 = vcmask 588800  }
  0x39   :  { %148 = vmatprep.subr.bf16.mxu1 %v883_v8  ;;  %108 = vmatpush1.bf16.msra.mxu0 %v880_v5  ;;  %s1020_s20 = smov 112   ;;  %s1021_s21 = smov 111   ;;  %v1188_v43 = vsub.s32 3, %v220_v39  ;;  %v1193_v44 = vld [vmem:[%s1522_s5] sm:$0xf]  ;;  %v1229_v5 = vsub.s32 0, %v220_v39 }
  0x3a   :  { %149 = vmatpush1.bf16.msra.mxu1 %v882_v9  ;;  %vm212_vm5 = vcmp.lt.s32.totalorder %v1186_v40, 17  ;;  %v1199_v47 = vld [vmem:[%s1522_s5 + $0x4] sm:$0xf]  ;;  %vm251_vm6 = vcmp.lt.s32.totalorder %v1186_v40, 16  ;;  %v1231_v7 = vsub.s32 1, %v220_v39  ;;  %v1233_v8 = vsub.s32 2, %v220_v39 }
  0x3b   :  { %v234_v48 = vrot.slane %v1193_v44, %v1188_v43  ;;  %v274_v49 = vrot.slane %v1199_v47, %v1188_v43  ;;  %v1238_v9 = vld [vmem:[%s1522_s5 + $0x8] sm:$0xf]  ;;  %vm291_vm7 = vcmp.lt.s32.totalorder %v1186_v40, 15  ;;  %vm331_vm8 = vcmp.lt.s32.totalorder %v1186_v40, 1 }
  0x3c   :  { %884 = vmatmul.mubr.msk.bf16.vlgmr.msra.gmra.mrb[0].mxu0 %vm103_vm0, %v77_v10  ;;  %v193_v13 = vstv %s65_s0  ;;  %vm371_vm9 = vcmp.lt.s32.totalorder %v1186_v40, 127  ;;  %vm411_vm10 = vcmp.lt.s32.totalorder %v1186_v40, 113  ;;  %vm451_vm11 = vcmp.lt.s32.totalorder %v1186_v40, 112 }
  0x3d   :  { %885 = vmatmul.mubr.msk.bf16.vlgmr.msra.gmra.mrb[0].mxu1 %vm103_vm0, %v77_v10  ;;  %598 = vmatprep.mubr.bf16.mxu0 %v1525_v6  ;;  %vm491_vm12 = vcmp.lt.s32.totalorder %v1186_v40, 111  ;;  %v543_v40 = vld [vmem:[#allocation6] sm:$0xf] }
  0x3e   :  { %639 = vmatprep.mubr.bf16.mxu1 %v1525_v6 }
  0xb7   :  { %v81_v11 = vpop.permute.xlu0 %80 }
 0x10f   :  { %v141_v12 = vpop.f32.mrb[0].mxu0 }
 0x110   :  { %v182_v14 = vpop.f32.mrb[0].mxu1  ;;  %v142_v15 = vadd.f32 %v141_v12, %v81_v11  ;;  %v143_v16 = vpop.f32.mrb[1].mxu0  ;;  %v222_v12 = vrot.slane %v1193_v44, %v1229_v5 }
 0x111   :  { %v183_v17 = vadd.f32 %v182_v14, %v81_v11  ;;  %v184_v18 = vpop.f32.mrb[1].mxu1  ;;  %v145_v19 = vpop.f32.mrb[2].mxu0  ;;  %v144_v26 = vadd.f32 %v143_v16, %v81_v11  ;;  %v1251_v14 = vld [vmem:[%s1522_s5 + $0xc] sm:$0xf]  ;;  %v262_v16 = vrot.slane %v1199_v47, %v1229_v5 }
 0x112   :  { %vm189_vm1 = vcmp.gt.f32.partialorder %v142_v15, 0.0  ;;  %v194_v20 = vmul.f32 %v193_v13, %v142_v15  ;;  %v185_v21 = vadd.f32 %v184_v18, %v81_v11  ;;  %v186_v22 = vpop.f32.mrb[2].mxu1  ;;  %v146_v23 = vpop.f32.mrb[3].mxu0  ;;  %v1263_v18 = vld [vmem:[%s1522_s5 + $0x14] sm:$0xf]  ;;  %v310_v19 = vrot.slane %v1238_v9, %v1233_v8 }
 0x113   :  { %vm191_vm2 = vcmp.gt.f32.partialorder %v183_v17, 0.0  ;;  %v196_v24 = vmul.f32 %v193_v13, %v183_v17  ;;  %v187_v25 = vpop.f32.mrb[3].mxu1  ;;  %v195_v30 = vmul.f32 %v193_v13, %v144_v26  ;;  %vm190_vm4 = vcmp.gt.f32.partialorder %v144_v26, 0.0  ;;  %v1277_v23 = vld [vmem:[%s1522_s5 + $0x18] sm:$0xf] }
 0x114   :  { %v1129_v27 = vsel %vm189_vm1, %v142_v15, %v194_v20  ;;  %v197_v28 = vmul.f32 %v193_v13, %v185_v21  ;;  %vm192_vm3 = vcmp.gt.f32.partialorder %v185_v21, 0.0  ;;  %v266_v13 = vrot.slane %v1199_v47, %v1231_v7 }
 0x115   :  { %v1131_v29 = vsel %vm191_vm2, %v183_v17, %v196_v24  ;;  %202 = vrot.lane.b32.xlu0 %v1129_v27, %s1014_s14  ;;  %v1142_v32 = vsel %vm190_vm4, %v144_v26, %v195_v30  ;;  %v270_v15 = vrot.slane %v1199_v47, %v1233_v8  ;;  %v306_v17 = vrot.slane %v1238_v9, %v1231_v7 }
 0x116   :  { %206 = vrot.lane.b32.xlu1 %v1131_v29, %s1014_s14  ;;  %v1137_v31 = vsel %vm192_vm3, %v185_v21, %v197_v28  ;;  %v302_v20 = vrot.slane %v1238_v9, %v1229_v5  ;;  %v314_v21 = vrot.slane %v1238_v9, %v1188_v43  ;;  %v346_v25 = vrot.slane %v1251_v14, %v1231_v7 }
 0x117   :  { %v350_v26 = vrot.slane %v1251_v14, %v1233_v8  ;;  %v342_v28 = vrot.slane %v1251_v14, %v1229_v5  ;;  %v394_v47 = vrot.slane %v1263_v18, %v1188_v43  ;;  %v1527_v9 = vrot.slane %v1263_v18, %v1229_v5 }
 0x118   :  { %vm682_vm3 = vcmask 64512  }
 0x119   :  { %208 = vrot.lane.b32.xlu0 %v1137_v31, %s1014_s14 }
 0x11a   :  { %243 = vrot.lane.b32.xlu1 %v1129_v27, %s1015_s15 }
 0x11d   :  { %245 = vrot.lane.b32.xlu0 %v1142_v32, %s1015_s15 }
 0x11e   :  { %247 = vrot.lane.b32.xlu1 %v1131_v29, %s1015_s15 }
 0x121   :  { %249 = vrot.lane.b32.xlu0 %v1137_v31, %s1015_s15 }
 0x122   :  { %283 = vrot.lane.b32.xlu1 %v1129_v27, %s1016_s16 }
 0x125   :  { %285 = vrot.lane.b32.xlu0 %v1142_v32, %s1016_s16 }
 0x126   :  { %287 = vrot.lane.b32.xlu1 %v1131_v29, %s1016_s16 }
 0x129   :  { %289 = vrot.lane.b32.xlu0 %v1137_v31, %s1016_s16 }
 0x12a   :  { %323 = vrot.lane.b32.xlu1 %v1129_v27, %s1017_s17 }
 0x12d   :  { %325 = vrot.lane.b32.xlu0 %v1142_v32, %s1017_s17 }
 0x12e   :  { %327 = vrot.lane.b32.xlu1 %v1131_v29, %s1017_s17 }
 0x131   :  { %329 = vrot.lane.b32.xlu0 %v1137_v31, %s1017_s17 }
 0x132   :  { %363 = vrot.lane.b32.xlu1 %v1129_v27, %s1018_s18 }
 0x135   :  { %365 = vrot.lane.b32.xlu0 %v1142_v32, %s1018_s18 }
 0x136   :  { %367 = vrot.lane.b32.xlu1 %v1131_v29, %s1018_s18 }
 0x139   :  { %369 = vrot.lane.b32.xlu0 %v1137_v31, %s1018_s18  ;;  %s878_s18 = sld [smem:[#allocation8 + $0x2]] }
 0x13a   :  { %403 = vrot.lane.b32.xlu1 %v1129_v27, %s1019_s19 }
 0x13d   :  { %405 = vrot.lane.b32.xlu0 %v1142_v32, %s1019_s19 }
 0x13e   :  { %407 = vrot.lane.b32.xlu1 %v1131_v29, %s1019_s19 }
 0x141   :  { %409 = vrot.lane.b32.xlu0 %v1137_v31, %s1019_s19  ;;  %s879_s19 = sld [smem:[#allocation8 + $0x3]] }
 0x142   :  { %204 = vrot.lane.b32.xlu1 %v1142_v32, %s1014_s14 }
 0x145   :  { %445 = vrot.lane.b32.xlu0 %v1142_v32, %s1020_s20 }
 0x146   :  { %443 = vrot.lane.b32.xlu1 %v1129_v27, %s1020_s20 }
 0x149   :  { %449 = vrot.lane.b32.xlu0 %v1137_v31, %s1020_s20 }
 0x14a   :  { %447 = vrot.lane.b32.xlu1 %v1131_v29, %s1020_s20 }
 0x14d   :  { %485 = vrot.lane.b32.xlu0 %v1142_v32, %s1021_s21 }
 0x14e   :  { %483 = vrot.lane.b32.xlu1 %v1129_v27, %s1021_s21 }
 0x151   :  { %489 = vrot.lane.b32.xlu0 %v1137_v31, %s1021_s21 }
 0x152   :  { %487 = vrot.lane.b32.xlu1 %v1131_v29, %s1021_s21 }
 0x155   :  { %669 = vperm.xlu0 %917, %v71_v33   ;;  %v354_v33 = vrot.slane %v1251_v14, %v1188_v43  ;;  %v230_v14 = vrot.slane %v1193_v44, %v1233_v8 }
 0x156   :  { %546 = vperm.xlu1 %918, %v70_v34  }
 0x15a   :  { %674 = vperm.xlu1 %918, %v72_v35   ;;  %v386_v35 = vrot.slane %v1263_v18, %v1231_v7 }
 0x187   :  { %v1182_v37 = vpop.permute.xlu0 %202 }
 0x188   :  { %v1184_v38 = vpop.permute.xlu1 %206 }
 0x18b   :  { %v209_v41 = vpop.permute.xlu0 %208 }
 0x18c   :  { %v244_v42 = vpop.permute.xlu1 %243  ;;  %v213_v50 = vsel %vm212_vm5, %v1184_v38, %v209_v41  ;;  %v216_v36 = vsel %vm212_vm5, %v209_v41, %v1182_v37 }
 0x18d   :  { %v242_v54 = vmul.f32 %v234_v48, %v213_v50 }
 0x18f   :  { %v246_v45 = vpop.permute.xlu0 %245 }
 0x190   :  { %v248_v46 = vpop.permute.xlu1 %247  ;;  %v254_v50 = vsel %vm251_vm6, %v244_v42, %v246_v45 }
 0x193   :  { %v250_v51 = vpop.permute.xlu0 %249 }
 0x194   :  { %v1209_v52 = vpop.permute.xlu1 %283  ;;  %v252_v53 = vsel %vm251_vm6, %v248_v46, %v250_v51  ;;  %v255_v24 = vsel %vm251_vm6, %v250_v51, %v244_v42 }
 0x195   :  { %v282_v55 = vmul.f32 %v274_v49, %v252_v53  ;;  %v1308_v49 = vld [vmem:[%s1522_s5 + $0x1c] sm:$0xf]  ;;  %v279_v51 = vmul.f32 %v262_v16, %v255_v24  ;;  %v434_v16 = vrot.slane %v1277_v23, %v1188_v43  ;;  %v239_v24 = vmul.f32 %v222_v12, %v216_v36 }
 0x196   :  { %v474_v36 = vrot.slane %v1308_v49, %v1188_v43 }
 0x197   :  { %v1213_v56 = vpop.permute.xlu0 %285  ;;  %v526_v57 = vpack.c.bf16 %v282_v55, %v242_v54  ;;  %v226_v54 = vrot.slane %v1193_v44, %v1231_v7  ;;  %v253_v55 = vsel %vm251_vm6, %v246_v45, %v248_v46  ;;  %v280_v46 = vmul.f32 %v266_v13, %v254_v50 }
 0x198   :  { %v1215_v58 = vpop.permute.xlu1 %287  ;;  %v294_v6 = vsel %vm291_vm7, %v1209_v52, %v1213_v56  ;;  %v281_v42 = vmul.f32 %v270_v15, %v253_v55  ;;  %v523_v41 = vpack.c.bf16 %v279_v51, %v239_v24 }
 0x199   :  { %607 = vmatprep.subr.bf16.mxu1 %v526_v57  ;;  %v293_v45 = vsel %vm291_vm7, %v1213_v56, %v1215_v58  ;;  %v320_v44 = vmul.f32 %v306_v17, %v294_v6 }
 0x19b   :  { %v1217_v59 = vpop.permute.xlu0 %289 }
 0x19c   :  { %v1219_v60 = vpop.permute.xlu1 %323  ;;  %v292_v12 = vsel %vm291_vm7, %v1215_v58, %v1217_v59 }
 0x19f   :  { %v1221_v61 = vpop.permute.xlu0 %325 }
 0x1a0   :  { %v1223_v62 = vpop.permute.xlu1 %327  ;;  %v334_v13 = vsel %vm331_vm8, %v1219_v60, %v1221_v61 }
 0x1a1   :  { %v333_v15 = vsel %vm331_vm8, %v1221_v61, %v1223_v62 }
 0x1a3   :  { %v1225_v63 = vpop.permute.xlu0 %329 }
 0x1a4   :  { %v1227_v3 = vpop.permute.xlu1 %363  ;;  %v332_v48 = vsel %vm331_vm8, %v1223_v62, %v1225_v63  ;;  %v335_v56 = vsel %vm331_vm8, %v1225_v63, %v1219_v60  ;;  %v295_v60 = vsel %vm291_vm7, %v1217_v59, %v1209_v52  ;;  %v360_v62 = vmul.f32 %v346_v25, %v334_v13 }
 0x1a5   :  { %v362_v55 = vmul.f32 %v354_v33, %v332_v48  ;;  %v322_v33 = vmul.f32 %v314_v21, %v292_v12  ;;  %v361_v48 = vmul.f32 %v350_v26, %v333_v15  ;;  %v359_v24 = vmul.f32 %v342_v28, %v335_v56 }
 0x1a6   :  { %v321_v21 = vmul.f32 %v310_v19, %v293_v45  ;;  %v319_v25 = vmul.f32 %v302_v20, %v295_v60  ;;  %v1529_v15 = vrot.slane %v1308_v49, %v1231_v7 }
 0x1a7   :  { %v1240_v10 = vpop.permute.xlu0 %365  ;;  %v530_v28 = vpack.c.bf16 %v362_v55, %v322_v33 }
 0x1a8   :  { %v1242_v11 = vpop.permute.xlu1 %367  ;;  %v529_v19 = vpack.c.bf16 %v361_v48, %v321_v21 }
 0x1ab   :  { %v1272_v22 = vpop.permute.xlu0 %369 }
 0x1ac   :  { %v1287_v30 = vpop.permute.xlu1 %403  ;;  %v375_v6 = vsel %vm371_vm9, %v1272_v22, %v1227_v3  ;;  %v372_v26 = vsel %vm371_vm9, %v1242_v11, %v1272_v22  ;;  %v892_v22 = vld [vmem:[%s1522_s5 + $0x20] sm:$0xf]  ;;  %s877_s5 = sld [smem:[#allocation8 + $0x1]] }
 0x1af   :  { %v1314_v53 = vpop.permute.xlu0 %405 }
 0x1b0   :  { %v1320_v57 = vpop.permute.xlu1 %407 }
 0x1b3   :  { %v410_v50 = vpop.permute.xlu0 %409 }
 0x1b4   :  { %v205_v51 = vpop.permute.xlu1 %204 }
 0x1b5   :  { %v214_v58 = vsel %vm212_vm5, %v205_v51, %v1184_v38  ;;  %v215_v61 = vsel %vm212_vm5, %v1182_v37, %v205_v51  ;;  %v373_v38 = vsel %vm371_vm9, %v1240_v10, %v1242_v11  ;;  %v374_v37 = vsel %vm371_vm9, %v1227_v3, %v1240_v10 }
 0x1b6   :  { %v240_v63 = vmul.f32 %v226_v54, %v215_v61  ;;  %v241_v17 = vmul.f32 %v230_v14, %v214_v58  ;;  %v402_v51 = vmul.f32 %v394_v47, %v375_v6  ;;  %v400_v54 = vmul.f32 %v386_v35, %v373_v38 }
 0x1b7   :  { %v446_v39 = vpop.permute.xlu0 %445  ;;  %v415_v3 = vsel %vm411_vm10, %v410_v50, %v1287_v30  ;;  %v528_v10 = vpack.c.bf16 %v360_v62, %v320_v44  ;;  %v527_v47 = vpack.c.bf16 %v359_v24, %v319_v25  ;;  %v399_v20 = vmul.f32 %v1527_v9, %v374_v37 }
 0x1b8   :  { %v525_v34 = vpack.c.bf16 %v281_v42, %v241_v17  ;;  %v444_v52 = vpop.permute.xlu1 %443  ;;  %v524_v59 = vpack.c.bf16 %v280_v46, %v240_v63  ;;  %v1528_v35 = vrot.slane %v1263_v18, %v1233_v8  ;;  %v413_v14 = vsel %vm411_vm10, %v1314_v53, %v1320_v57 }
 0x1b9   :  { %v534_v45 = vpack.c.bf16 %v402_v51, %v1137_v31  ;;  %v442_v44 = vmul.f32 %v434_v16, %v415_v3  ;;  %v454_v13 = vsel %vm451_vm11, %v444_v52, %v446_v39  ;;  %v532_v55 = vpack.c.bf16 %v400_v54, %v1142_v32 }
 0x1ba   :  { %566 = vmatprep.subr.bf16.mxu0 %v524_v59  ;;  %608 = vmatpush1.bf16.msra.mxu1 %v525_v34  ;;  %v401_v34 = vmul.f32 %v1528_v35, %v372_v26  ;;  %v502_v31 = vrot.slane %v892_v22, %v1229_v5  ;;  %v412_v16 = vsel %vm411_vm10, %v1320_v57, %v410_v50 }
 0x1bb   :  { %567 = vmatpush1.bf16.msra.mxu0 %v523_v41  ;;  %609 = vmatprep.subr.bf16.mxu1 %v530_v28  ;;  %v450_v11 = vpop.permute.xlu0 %449  ;;  %v506_v58 = vrot.slane %v892_v22, %v1231_v7  ;;  %v414_v61 = vsel %vm411_vm10, %v1287_v30, %v1314_v53  ;;  %v1530_v32 = vrot.slane %v1277_v23, %v1231_v7 }
 0x1bc   :  { %v448_v42 = vpop.permute.xlu1 %447  ;;  %568 = vmatprep.subr.bf16.mxu0 %v528_v10  ;;  %v455_v41 = vsel %vm451_vm11, %v450_v11, %v444_v52  ;;  %v1531_v57 = vrot.slane %v1308_v49, %v1233_v8  ;;  %v531_v63 = vpack.c.bf16 %v399_v20, %v1129_v27  ;;  %v514_v30 = vrot.slane %v892_v22, %v1188_v43 }
 0x1bd   :  { %v453_v46 = vsel %vm451_vm11, %v446_v39, %v448_v42  ;;  %v452_v18 = vsel %vm451_vm11, %v448_v42, %v450_v11  ;;  %v482_v12 = vmul.f32 %v474_v36, %v455_v41  ;;  %v533_v39 = vpack.c.bf16 %v401_v34, %v1131_v29 }
 0x1be   :  { %v480_v56 = vmul.f32 %v1529_v15, %v453_v46  ;;  %610 = vmatpush1.bf16.msra.mxu1 %v529_v19  ;;  %v440_v60 = vmul.f32 %v1530_v32, %v413_v14  ;;  %v481_v50 = vmul.f32 %v1531_v57, %v452_v18  ;;  %v1532_v29 = vrot.slane %v1308_v49, %v1229_v5 }
 0x1bf   :  { %569 = vmatpush1.bf16.msra.mxu0 %v527_v47  ;;  %611 = vmatprep.subr.bf16.mxu1 %v534_v45  ;;  %v486_v6 = vpop.permute.xlu0 %485  ;;  %v538_v36 = vpack.c.bf16 %v482_v12, %v442_v44  ;;  %v1533_v7 = vrot.slane %v1277_v23, %v1233_v8  ;;  %v510_v38 = vrot.slane %v892_v22, %v1233_v8  ;;  %v1535_v47 = vmov 0  }
 0x1c0   :  { %v484_v62 = vpop.permute.xlu1 %483  ;;  %570 = vmatprep.subr.bf16.mxu0 %v532_v55  ;;  %v479_v17 = vmul.f32 %v1532_v29, %v454_v13  ;;  %v536_v24 = vpack.c.bf16 %v480_v56, %v440_v60  ;;  %v1534_v27 = vrot.slane %v1277_v23, %v1229_v5  ;;  %v652_v11 = vstv %s877_s5 }
 0x1c1   :  { %v494_v33 = vsel %vm491_vm12, %v484_v62, %v486_v6  ;;  %v441_v53 = vmul.f32 %v1533_v7, %v412_v16  ;;  %v1477_v29 = vstv %s878_s18  ;;  %v810_v7 = vunpack.c.h.bf16 %v1095_v0 }
 0x1c2   :  { %v519_v48 = vmul.f32 %v502_v31, %v494_v33  ;;  %612 = vmatpush1.bf16.msra.mxu1 %v533_v39  ;;  %v439_v37 = vmul.f32 %v1534_v27, %v414_v61 }
 0x1c3   :  { %571 = vmatpush1.bf16.msra.mxu0 %v531_v63  ;;  %613 = vmatprep.subr.bf16.mxu1 %v538_v36  ;;  %v490_v49 = vpop.permute.xlu0 %489  ;;  %v537_v51 = vpack.c.bf16 %v481_v50, %v441_v53  ;;  %v923_v50 = vld [vmem:[%s1520_s3] sm:$0xff]   ;;  %s1022_s3 = smov [#allocation9]  }
 0x1c4   :  { %v488_v52 = vpop.permute.xlu1 %487  ;;  %572 = vmatprep.subr.bf16.mxu0 %v536_v24  ;;  %v495_v43 = vsel %vm491_vm12, %v490_v49, %v484_v62  ;;  %v535_v59 = vpack.c.bf16 %v479_v17, %v439_v37  ;;  %v539_v26 = vpack.c.bf16 %v519_v48, %v519_v48  ;;  %v809_v17 = vunpack.c.l.bf16 %v1095_v0  ;;  %s863_s20 = sshll.u32 %s1022_s3, 4  ;;  %s864_s20 = int_to_ptr.vmem [resolvable:$true] %s863_s20 }
 0x1c5   :  { %v493_v21 = vsel %vm491_vm12, %v486_v6, %v488_v52  ;;  %v492_v8 = vsel %vm491_vm12, %v488_v52, %v490_v49  ;;  %v522_v25 = vmul.f32 %v514_v30, %v495_v43  ;;  %v811_v30 = vunpack.c.l.bf16 %v1105_v2  ;;  %s980_s21 = scalar_lea.vmem %s864_s20, 1024  ;;  %p985_p8 = scmp.lt.s32.totalorder %s864_s20, %s864_s20 }
 0x1c6   :  { %v520_v5 = vmul.f32 %v506_v58, %v493_v21  ;;  %v521_v23 = vmul.f32 %v510_v38, %v492_v8  ;;  %614 = vmatpush1.bf16.msra.mxu1 %v537_v51  ;;  %v555_v10 = vsel %vm553_vm13, %v539_v26, 0  ;;  %v1482_v48 = vstv %s879_s19  ;;  %p981_p7 = scmp.ne.s32.totalorder %s864_s20, %s980_s21  ;;  %p986_p9 = scmp.lt.s32.totalorder %s980_s21, %s980_s21 }
 0x1c7   :  { %v542_v28 = vpack.c.bf16 %v522_v25, %v522_v25  ;;  %573 = vmatpush1.bf16.msra.mxu0 %v535_v59  ;;  %v812_v37 = vunpack.c.h.bf16 %v1105_v2  ;;  %v813_v43 = vunpack.c.l.bf16 %v1100_v1  ;;  %v815_v21 = vunpack.c.l.bf16 %v1112_v4 }
 0x1c8   :  { %v540_v54 = vpack.c.bf16 %v520_v5, %v520_v5  ;;  %v541_v3 = vpack.c.bf16 %v521_v23, %v521_v23  ;;  %p987_p10 = por %p986_p9, %p985_p8 }
 0x1c9   :  { %895 = vmatprep.subr.msk.bf16.mxu1 %vm553_vm13, %v542_v28 }
 0x1ca   :  { %893 = vmatprep.subr.msk.bf16.mxu0 %vm553_vm13, %v540_v54  ;;  %v561_v19 = vsel %vm553_vm13, %v541_v3, 0  ;;  %p988_p11 = pnand %p987_p10, %p981_p7 }
 0x1cb   :  { %575 = vmatpush1.bf16.msra.mxu0 %v555_v10  ;;  %616 = vmatpush1.bf16.msra.mxu1 %v561_v19 }
 0x1ce   :  { %894 = vmatmul.mubr.msk.bf16.vlgmr.msra.gmra.mrb[4].mxu0 %vm549_vm14, %v543_v40  ;;  %896 = vmatmul.mubr.msk.bf16.vlgmr.msra.gmra.mrb[4].mxu1 %vm549_vm14, %v543_v40 }
 0x1cf   :  { %730 = vmatprep.mubr.bf16.mxu0 %v1535_v47  ;;  %773 = vmatprep.mubr.bf16.mxu1 %v1535_v47 }
 0x1d4   :  { %v670_v62 = vpop.permute.xlu0 %669 }
 0x1d5   :  { %v547_v9 = vpop.permute.xlu1 %546 }
 0x1d9   :  { %v675_v5 = vpop.permute.xlu1 %674 }
 0x2a1   :  { %v600_v20 = vpop.f32.mrb[4].mxu0  ;;  %v641_v22 = vpop.f32.mrb[4].mxu1 }
 0x2a2   :  { %v601_v35 = vadd.f32 %v600_v20, %v547_v9  ;;  %v642_v34 = vadd.f32 %v641_v22, %v547_v9  ;;  %v602_v14 = vpop.f32.mrb[5].mxu0  ;;  %v643_v42 = vpop.f32.mrb[5].mxu1 }
 0x2a3   :  { %v603_v41 = vadd.f32 %v602_v14, %v547_v9  ;;  %v644_v45 = vadd.f32 %v643_v42, %v547_v9  ;;  %v604_v44 = vpop.f32.mrb[6].mxu0  ;;  %v645_v46 = vpop.f32.mrb[6].mxu1 }
 0x2a4   :  { %vm648_vm15 = vcmp.gt.f32.partialorder %v601_v35, 0.0  ;;  %v653_v18 = vmul.f32 %v652_v11, %v601_v35  ;;  %vm650_vm0 = vcmp.gt.f32.partialorder %v642_v34, 0.0  ;;  %v655_v12 = vmul.f32 %v652_v11, %v642_v34  ;;  %v605_v13 = vpop.f32.mrb[7].mxu0  ;;  %v646_v15 = vpop.f32.mrb[7].mxu1 }
 0x2a5   :  { %vm649_vm1 = vcmp.gt.f32.partialorder %v603_v41, 0.0  ;;  %v654_v56 = vmul.f32 %v652_v11, %v603_v41  ;;  %vm651_vm2 = vcmp.gt.f32.partialorder %v644_v45, 0.0  ;;  %v656_v55 = vmul.f32 %v652_v11, %v644_v45 }
 0x2a6   :  { %v657_v31 = vsel %vm648_vm15, %v601_v35, %v653_v18  ;;  %v659_v16 = vsel %vm650_vm0, %v642_v34, %v655_v12 }
 0x2a7   :  { %v663_v6 = vpack.c.bf16 %v657_v31, %v657_v31  ;;  %v665_v36 = vpack.c.bf16 %v659_v16, %v659_v16  ;;  %v658_v58 = vsel %vm649_vm1, %v603_v41, %v654_v56  ;;  %v660_v39 = vsel %vm651_vm2, %v644_v45, %v656_v55 }
 0x2a8   :  { %v664_v61 = vpack.c.bf16 %v658_v58, %v658_v58  ;;  %v666_v32 = vpack.c.bf16 %v660_v39, %v660_v39  ;;  %v814_v56 = vunpack.c.h.bf16 %v1100_v1 }
 0x2a9   :  { %v687_v60 = vsel %vm553_vm13, %v663_v6, 0  ;;  %v693_v57 = vsel %vm553_vm13, %v665_v36, 0  ;;  %v816_v6 = vunpack.c.h.bf16 %v1112_v4 }
 0x2aa   :  { %898 = vmatprep.subr.msk.bf16.mxu0 %vm553_vm13, %v664_v61  ;;  %900 = vmatprep.subr.msk.bf16.mxu1 %vm553_vm13, %v666_v32 }
 0x2ab   :  { %699 = vmatpush1.bf16.msra.mxu0 %v687_v60  ;;  %742 = vmatpush1.bf16.msra.mxu1 %v693_v57 }
 0x2ae   :  { %899 = vmatmul.mubr.msk.bf16.vlgmr.msra.gmra.mrb[8].mxu0 %vm682_vm3, %v923_v50  ;;  %901 = vmatmul.mubr.msk.bf16.vlgmr.msra.gmra.mrb[8].mxu1 %vm682_vm3, %v923_v50 }
 0x381   :  { %v732_v63 = vpop.f32.mrb[8].mxu0  ;;  %v775_v33 = vpop.f32.mrb[8].mxu1 }
 0x382   :  { %v733_v53 = vadd.f32 %v732_v63, %v670_v62  ;;  %v776_v24 = vadd.f32 %v775_v33, %v670_v62  ;;  %v734_v38 = vpop.f32.mrb[9].mxu0  ;;  %v777_v27 = vpop.f32.mrb[9].mxu1 }
 0x383   :  { %v735_v49 = vadd.f32 %v734_v38, %v670_v62  ;;  %v778_v51 = vadd.f32 %v777_v27, %v670_v62  ;;  %v736_v52 = vpop.f32.mrb[10].mxu0  ;;  %v779_v59 = vpop.f32.mrb[10].mxu1 }
 0x384   :  { %vm784_vm4 = vcmp.gt.f32.partialorder %v733_v53, 0.0  ;;  %v793_v8 = vmul.f32 %v1477_v29, %v733_v53  ;;  %vm786_vm5 = vcmp.gt.f32.partialorder %v776_v24, 0.0  ;;  %v795_v0 = vmul.f32 %v1477_v29, %v776_v24  ;;  %v738_v25 = vpop.f32.mrb[11].mxu0  ;;  %v781_v26 = vpop.f32.mrb[11].mxu1 }
 0x385   :  { %vm785_vm6 = vcmp.gt.f32.partialorder %v735_v49, 0.0  ;;  %v794_v2 = vmul.f32 %v1477_v29, %v735_v49  ;;  %vm787_vm7 = vcmp.gt.f32.partialorder %v778_v51, 0.0  ;;  %v796_v23 = vmul.f32 %v1477_v29, %v778_v51 }
 0x386   :  { %v801_v28 = vsel %vm784_vm4, %v733_v53, %v793_v8  ;;  %v803_v54 = vsel %vm786_vm5, %v776_v24, %v795_v0  ;;  %v737_v3 = vadd.f32 %v736_v52, %v675_v5  ;;  %v780_v10 = vadd.f32 %v779_v59, %v675_v5 }
 0x387   :  { %v817_v19 = vadd.f32 %v809_v17, %v801_v28  ;;  %v819_v40 = vadd.f32 %v811_v30, %v803_v54  ;;  %v802_v47 = vsel %vm785_vm6, %v735_v49, %v794_v2  ;;  %v804_v9 = vsel %vm787_vm7, %v778_v51, %v796_v23 }
 0x388   :  { %v818_v20 = vadd.f32 %v810_v7, %v802_v47  ;;  %v820_v11 = vadd.f32 %v812_v37, %v804_v9  ;;  %vm788_vm8 = vcmp.gt.f32.partialorder %v737_v3, 0.0  ;;  %v797_v22 = vmul.f32 %v1477_v29, %v737_v3 }
 0x389   :  { %vm825_vm9 = vcmp.gt.f32.partialorder %v817_v19, 0.0  ;;  %v834_v35 = vmul.f32 %v1482_v48, %v817_v19  ;;  %vm827_vm10 = vcmp.gt.f32.partialorder %v819_v40, 0.0  ;;  %v836_v34 = vmul.f32 %v1482_v48, %v819_v40 }
 0x38a   :  { %vm826_vm11 = vcmp.gt.f32.partialorder %v818_v20, 0.0  ;;  %v835_v14 = vmul.f32 %v1482_v48, %v818_v20  ;;  %vm828_vm12 = vcmp.gt.f32.partialorder %v820_v11, 0.0  ;;  %v837_v42 = vmul.f32 %v1482_v48, %v820_v11 }
 0x38b   :  { %v842_v41 = vsel %vm825_vm9, %v817_v19, %v834_v35  ;;  %v844_v45 = vsel %vm827_vm10, %v819_v40, %v836_v34  ;;  %v805_v44 = vsel %vm788_vm8, %v737_v3, %v797_v22  ;;  %vm790_vm13 = vcmp.gt.f32.partialorder %v780_v10, 0.0 }
 0x38c   :  { %850 = vst [vmem:[#allocation9] sm:$0xff] %v842_v41  ;;  %852 = vst [vmem:[#allocation9 + $0x10] sm:$0xff] %v844_v45  ;;  %v843_v46 = vsel %vm826_vm11, %v818_v20, %v835_v14  ;;  %v845_v18 = vsel %vm828_vm12, %v820_v11, %v837_v42  ;;  %v821_v12 = vadd.f32 %v813_v43, %v805_v44 }
 0x38d   :  { %v799_v13 = vmul.f32 %v1477_v29, %v780_v10  ;;  %851 = vst [vmem:[#allocation9 + $0x8] sm:$0xff] %v843_v46  ;;  %853 = vst [vmem:[#allocation9 + $0x18] sm:$0xff] %v845_v18  ;;  %v739_v15 = vadd.f32 %v738_v25, %v675_v5  ;;  %v782_v55 = vadd.f32 %v781_v26, %v675_v5 }
 0x38e   :  { %vm829_vm14 = vcmp.gt.f32.partialorder %v821_v12, 0.0  ;;  %v838_v31 = vmul.f32 %v1482_v48, %v821_v12 }
 0x38f   :  { %v807_v16 = vsel %vm790_vm13, %v780_v10, %v799_v13  ;;  %vm789_vm15 = vcmp.gt.f32.partialorder %v739_v15, 0.0  ;;  %v798_v58 = vmul.f32 %v1477_v29, %v739_v15  ;;  %vm791_vm0 = vcmp.gt.f32.partialorder %v782_v55, 0.0 }
 0x390   :  { %v823_v36 = vadd.f32 %v815_v21, %v807_v16  ;;  %v846_v39 = vsel %vm829_vm14, %v821_v12, %v838_v31  ;;  %v800_v61 = vmul.f32 %v1477_v29, %v782_v55 }
 0x391   :  { %854 = vst [vmem:[#allocation9 + $0x20] sm:$0xff] %v846_v39  ;;  %v806_v1 = vsel %vm789_vm15, %v739_v15, %v798_v58 }
 0x392   :  { %vm831_vm1 = vcmp.gt.f32.partialorder %v823_v36, 0.0  ;;  %v840_v32 = vmul.f32 %v1482_v48, %v823_v36  ;;  %v822_v60 = vadd.f32 %v814_v56, %v806_v1  ;;  %v808_v57 = vsel %vm791_vm0, %v782_v55, %v800_v61 }
 0x393   :  { %v824_v62 = vadd.f32 %v816_v6, %v808_v57 }
 0x394   :  { %v848_v50 = vsel %vm831_vm1, %v823_v36, %v840_v32  ;;  %vm830_vm2 = vcmp.gt.f32.partialorder %v822_v60, 0.0  ;;  %v839_v4 = vmul.f32 %v1482_v48, %v822_v60 }
 0x395   :  { %856 = vst [vmem:[#allocation9 + $0x30] sm:$0xff] %v848_v50  ;;  %vm832_vm3 = vcmp.gt.f32.partialorder %v824_v62, 0.0  ;;  %v841_v63 = vmul.f32 %v1482_v48, %v824_v62 }
 0x396   :  { %v847_v29 = vsel %vm830_vm2, %v822_v60, %v839_v4 }
 0x397   :  { %855 = vst [vmem:[#allocation9 + $0x28] sm:$0xff] %v847_v29  ;;  %v849_v17 = vsel %vm832_vm3, %v824_v62, %v841_v63 }
 0x398   :  { %857 = vst [vmem:[#allocation9 + $0x38] sm:$0xff] %v849_v17 }
 0x399   :  { %991 = shalt.err (!%p988_p11)
}
 0x39a   :  { %s992_s23 = scalar_lea.hbm %s1524_s7, 1024 }
 0x39b   :  { %p993_p12 = scmp.ne.s32.totalorder %s1524_s7, %s992_s23  ;;  %p996_p13 = scmp.lt.u32.totalorder %s992_s23, %s1524_s7 }
 0x39d   :  { %p998_p0 = pnand %p996_p13, %p993_p12 }
 0x39f   :  { %1001 = shalt.err (!%p998_p0)
}
 0x3a0   :  { %s1023_s29 = smov 512   ;;  %s1024_s4 = smov 32  }
 0x3a1   :  { %869 = dma.vmem_to_hbm [thread:$0]  %s864_s20, 1024, %s1524_s7, [#allocation4], %s1023_s29, %s1023_s29, %s1024_s4  }
 0x3a2   :  { %1008 = dma.done.wait [#allocation4], 1024  }
 0x3a3   :  { %1009 = vsyncadd [#allocation4], 4294966272 }
 0x3a4   :  { %873 = vsyncpa [#allocation3], 1 }
 0x3a5   :  { %874 = vsyncpa [#allocation7], 1 }
 0x3a6   :  { %875 = vsyncpa [#allocation4], 1 }
 0x3a7   :  { %876 = vsyncpa [#allocation5], 1 }

</bundles_post_ra>
